<compile_context>
chip_gen: v7x
topology: tpu7x:2x2x1
jax: 0.10.0
libtpu: 0.0.40
codegen_flags: <defaults>
</compile_context>

<pallas_src>
import functools

import jax
import jax.numpy as jnp
from jax.experimental import pallas as pl
from jax.experimental.pallas import tpu as pltpu

_EPS = 1e-5
_LANE = 128
_SUB = 8           # f32 sublane count (stats block height)
_SUB_BF16 = 16     # bf16 sublane packing; batch tiles are multiples of this


def _round_up(x, m):
    return (x + m - 1) // m * m


def _vmem_budget_bytes():
    """Generation-aware VMEM budget: ~48 MiB on v7x (64 MiB VMEM), ~96 MiB on v5e/v6e."""
    cap = 64 * 1024 * 1024                      # conservative default (v7x)
    try:
        info = pltpu.get_tpu_info()
        cap = int(getattr(info, "vmem_capacity_bytes", cap) or cap)
    except Exception:
        pass
    return min(cap * 3 // 4, 100 * 1024 * 1024)


# --------------------------------------------------------------------------- kernels
def _linear_relu_stats_kernel(x_ref, w_ref, b_ref, h_ref, stats_ref, *,
                              tile_b, true_b, mm_dtype):
    """One batch tile of h = relu(x @ W + b), stored bf16.

    Also writes per-tile BN partial statistics (row 0: sum, row 1: sum of squares,
    rows 2..7: zero padding for the 8-sublane block) computed from the f32 `h`
    with padded batch rows masked out.
    """
    i = pl.program_id(0)

    h = jnp.dot(x_ref[...].astype(mm_dtype), w_ref[...],
                preferred_element_type=jnp.float32) + b_ref[...]
    h = jnp.maximum(h, 0.0)
    h_ref[...] = h.astype(h_ref.dtype)          # bf16 store; stats below stay f32

    if true_b % tile_b != 0:                    # batch padded -> mask pad rows from stats
        row = jax.lax.broadcasted_iota(jnp.int32, h.shape, 0) + i * tile_b
        h = jnp.where(row < true_b, h, 0.0)

    s = jnp.sum(h, axis=0, keepdims=True)
    q = jnp.sum(h * h, axis=0, keepdims=True)
    pad = jnp.zeros((stats_ref.shape[0] - 2, h.shape[1]), jnp.float32)
    stats_ref[...] = jnp.concatenate([s, q, pad], axis=0)   # single lane-dense store


def _linear_kernel(x_ref, w_ref, b_ref, o_ref, *, mm_dtype):
    """One batch tile of the final layer: out = x @ W + b (BN2 pre-folded into W/b)."""
    o = jnp.dot(x_ref[...].astype(mm_dtype), w_ref[...],
                preferred_element_type=jnp.float32) + b_ref[...]
    o_ref[...] = o.astype(o_ref.dtype)


# --------------------------------------------------------------------------- wrappers
def _linear_relu_stats(x, w, b, *, tile_b, true_b, mm_dtype, out_dtype, vmem_limit):
    bp, cin = x.shape
    cout = w.shape[1]
    nb = bp // tile_b

    kernel = functools.partial(_linear_relu_stats_kernel,
                               tile_b=tile_b, true_b=true_b, mm_dtype=mm_dtype)
    flops = 2 * bp * cin * cout
    bytes_accessed = (bp * cin * x.dtype.itemsize
                      + bp * cout * jnp.dtype(out_dtype).itemsize
                      + nb * _SUB * cout * 4
                      + cin * cout * w.dtype.itemsize + cout * 4)

    return pl.pallas_call(
        kernel,
        grid=(nb,),
        in_specs=[
            pl.BlockSpec((tile_b, cin), lambda i: (i, 0)),   # activation tile
            pl.BlockSpec((cin, cout), lambda i: (0, 0)),     # weight (resident)
            pl.BlockSpec((1, cout), lambda i: (0, 0)),       # bias (resident)
        ],
        out_specs=(
            pl.BlockSpec((tile_b, cout), lambda i: (i, 0)),  # h tile (bf16)
            pl.BlockSpec((_SUB, cout), lambda i: (i, 0)),    # per-tile partial stats
        ),
        out_shape=(
            jax.ShapeDtypeStruct((bp, cout), out_dtype),
            jax.ShapeDtypeStruct((nb * _SUB, cout), jnp.float32),
        ),
        compiler_params=pltpu.CompilerParams(
            dimension_semantics=("parallel",),
            vmem_limit_bytes=vmem_limit),
        cost_estimate=pl.CostEstimate(flops=flops, transcendentals=0,
                                      bytes_accessed=bytes_accessed),
    )(x, w, b)


def _linear(x, w, b, *, tile_b, mm_dtype, out_dtype, vmem_limit):
    bp, cin = x.shape
    cout = w.shape[1]
    nb = bp // tile_b

    kernel = functools.partial(_linear_kernel, mm_dtype=mm_dtype)
    flops = 2 * bp * cin * cout
    bytes_accessed = (bp * cin * x.dtype.itemsize
                      + bp * cout * jnp.dtype(out_dtype).itemsize
                      + cin * cout * w.dtype.itemsize + cout * 4)

    return pl.pallas_call(
        kernel,
        grid=(nb,),
        in_specs=[
            pl.BlockSpec((tile_b, cin), lambda i: (i, 0)),
            pl.BlockSpec((cin, cout), lambda i: (0, 0)),
            pl.BlockSpec((1, cout), lambda i: (0, 0)),
        ],
        out_specs=pl.BlockSpec((tile_b, cout), lambda i: (i, 0)),
        out_shape=jax.ShapeDtypeStruct((bp, cout), out_dtype),
        compiler_params=pltpu.CompilerParams(
            dimension_semantics=("parallel",),
            vmem_limit_bytes=vmem_limit),
        cost_estimate=pl.CostEstimate(flops=flops, transcendentals=0,
                                      bytes_accessed=bytes_accessed),
    )(x, w, b)


def _bn_scale_shift(partial_stats, gamma, beta, true_b):
    """Combine per-tile partial stats -> fused BN scale/shift (biased var, eps=1e-5).

    Note: uses E[x^2] - mean^2 in f32 (matches the precision-matched reference); a
    shifted/Welford combine could be used if tighter torch parity is ever needed.
    """
    stats = partial_stats.reshape(-1, _SUB, partial_stats.shape[-1])
    s = jnp.sum(stats[:, 0, :], axis=0)
    q = jnp.sum(stats[:, 1, :], axis=0)
    mu = s / true_b
    var = jnp.maximum(q / true_b - mu * mu, 0.0)
    scale = gamma * jax.lax.rsqrt(var + _EPS)     # (1, C)
    shift = beta - mu * scale                     # (1, C)
    return scale, shift


@functools.partial(jax.jit, static_argnames=("tile_b", "mm_dtype"))
def mlp_forward(x, params, *, tile_b=1024, mm_dtype=jnp.bfloat16):
    """x: (B, F) float32. params: dict of pre-transposed weights/biases (see init_params)."""
    B, F = x.shape
    H = params["w1"].shape[1]
    f32 = jnp.float32
    hi = jax.lax.Precision.HIGHEST

    Fp = _round_up(F, _LANE)
    Hp = _round_up(H, _LANE)
    OUTp = _LANE                      # lane-dense output slab; real column is [:, 0]

    # ----- batch tile: VMEM-budget derived, megacore-friendly, bf16-sublane packed
    budget = _vmem_budget_bytes()
    # heaviest layer (layer 2): bf16 in/out tiles + resident bf16 weight, all double-buffered
    resident = 2 * (Hp * Hp * 2 + Hp * 4 + _SUB * Hp * 4)
    per_row = 2 * (max(Fp, Hp) * 2 + Hp * 2)
    tb = min(int(tile_b), max(_SUB_BF16, (budget - resident) // max(per_row, 1)))
    if B > _SUB_BF16:                 # >= 2 batch tiles so both v7x TensorCores get work
        tb = min(tb, _round_up(-(-B // 2), _SUB_BF16))
    tb = max(_SUB_BF16, tb // _SUB_BF16 * _SUB_BF16)
    Bp = _round_up(max(B, tb), tb)
    vmem_limit = int(budget)

    # ----- padding (exact: padded feature columns / weight rows / gamma / beta are zero)
    xp = jnp.pad(x, ((0, Bp - B), (0, Fp - F))).astype(mm_dtype)  # bf16 layer-1 input

    def pad2(a, r, c, dtype=f32):
        a = a.astype(f32)
        return jnp.pad(a, ((0, r - a.shape[0]), (0, c - a.shape[1]))).astype(dtype)

    w1 = pad2(params["w1"], Fp, Hp, mm_dtype)
    b1 = pad2(params["b1"], 1, Hp)
    g1, be1 = pad2(params["g1"], 1, Hp), pad2(params["be1"], 1, Hp)
    w2f = pad2(params["w2"], Hp, Hp)            # kept f32 for the BN1 fold
    b2 = pad2(params["b2"], 1, Hp)
    g2, be2 = pad2(params["g2"], 1, Hp), pad2(params["be2"], 1, Hp)
    w3f = pad2(params["w3"], Hp, OUTp)          # kept f32 for the BN2 fold
    b3 = pad2(params["b3"], 1, OUTp)

    # Layer 1: h1 = relu(x @ W1 + b1)  (+ BN1 partial stats)
    h1, st1 = _linear_relu_stats(xp, w1, b1, tile_b=tb, true_b=B,
                                 mm_dtype=mm_dtype, out_dtype=mm_dtype,
                                 vmem_limit=vmem_limit)
    scale1, shift1 = _bn_scale_shift(st1, g1, be1, B)

    # Fold BN1 into layer 2 (tiny wrapper-side op): W2' = scale1^T * W2, b2' = shift1 @ W2 + b2
    w2 = (scale1.T * w2f).astype(mm_dtype)
    b2e = jnp.dot(shift1, w2f, precision=hi) + b2

    # Layer 2: h2 = relu(h1 @ W2' + b2')  (+ BN2 partial stats)
    h2, st2 = _linear_relu_stats(h1, w2, b2e, tile_b=tb, true_b=B,
                                 mm_dtype=mm_dtype, out_dtype=mm_dtype,
                                 vmem_limit=vmem_limit)
    scale2, shift2 = _bn_scale_shift(st2, g2, be2, B)

    # Fold BN2 into layer 3: W3' = scale2^T * W3, b3' = shift2 @ W3 + b3
    w3 = (scale2.T * w3f).astype(mm_dtype)
    b3e = jnp.dot(shift2, w3f, precision=hi) + b3

    # Layer 3: out = h2 @ W3' + b3'   (bf16 lane-dense (Bp, 128) slab, sliced below)
    out = _linear(h2, w3, b3e, tile_b=tb, mm_dtype=mm_dtype,
                  out_dtype=mm_dtype, vmem_limit=vmem_limit)
    return out[:B, :1].astype(f32)


# --------------------------------------------------------------------------- params / reference
def init_params(key, num_features, num_hidden):
    """PyTorch-default init: Linear ~ U(-1/sqrt(fan_in), 1/sqrt(fan_in)),
    BatchNorm1d gamma=1, beta=0. Weights stored transposed: (in, out)."""
    ks = jax.random.split(key, 6)

    def lin(kw, kb, fan_in, fan_out):
        bound = 1.0 / jnp.sqrt(fan_in)
        w = jax.random.uniform(kw, (fan_in, fan_out), jnp.float32, -bound, bound)
        b = jax.random.uniform(kb, (1, fan_out), jnp.float32, -bound, bound)
        return w, b

    w1, b1 = lin(ks[0], ks[1], num_features, num_hidden)
    w2, b2 = lin(ks[2], ks[3], num_hidden, num_hidden)
    w3, b3 = lin(ks[4], ks[5], num_hidden, 1)
    return {
        "w1": w1, "b1": b1,
        "g1": jnp.ones((1, num_hidden), jnp.float32),
        "be1": jnp.zeros((1, num_hidden), jnp.float32),
        "w2": w2, "b2": b2,
        "g2": jnp.ones((1, num_hidden), jnp.float32),
        "be2": jnp.zeros((1, num_hidden), jnp.float32),
        "w3": w3, "b3": b3,
    }


def _reference_forward(x, p, mm_dtype=jnp.bfloat16):
    """Pure-JAX reference with matching precision: bf16 matmuls / f32 accumulation,
    f32 BN statistics, bf16 inter-layer activations, BN folded into the next linear."""
    f32 = jnp.float32
    hi = jax.lax.Precision.HIGHEST

    def mm(a, w):
        return jnp.dot(a.astype(mm_dtype), w.astype(mm_dtype),
                       preferred_element_type=f32)

    def bn_coeffs(h, g, be):
        mu = jnp.mean(h, 0, keepdims=True)
        var = jnp.maximum(jnp.mean(h * h, 0, keepdims=True) - mu * mu, 0.0)
        scale = g * jax.lax.rsqrt(var + _EPS)
        return scale, be - mu * scale

    h1 = jnp.maximum(mm(x, p["w1"]) + p["b1"], 0.0)             # f32
    s1, t1 = bn_coeffs(h1, p["g1"], p["be1"])                   # stats from f32 h1
    h1b = h1.astype(mm_dtype)                                   # bf16 HBM storage
    w2e = s1.T * p["w2"]
    b2e = jnp.dot(t1, p["w2"], precision=hi) + p["b2"]
    h2 = jnp.maximum(mm(h1b, w2e) + b2e, 0.0)
    s2, t2 = bn_coeffs(h2, p["g2"], p["be2"])
    h2b = h2.astype(mm_dtype)
    w3e = s2.T * p["w3"]
    b3e = jnp.dot(t2, p["w3"], precision=hi) + p["b3"]
    return mm(h2b, w3e) + b3e                                   # f32 reference output


if __name__ == "__main__":
    key = jax.random.PRNGKey(0)
    k_x, k_p = jax.random.split(key)

    # Small demo: batch=20 with the derived tile of 16 rows -> 2 batch tiles
    # (megacore path), last tile partially padded -> exercises masked BN stats.
    batch, num_features, num_hidden = 20, 16, 32
    x = jax.random.normal(k_x, (batch, num_features), jnp.float32)
    params = init_params(k_p, num_features, num_hidden)

    out = mlp_forward(x, params)
    out = jax.block_until_ready(out)

    ref = _reference_forward(x, params)
    assert out.shape == (batch, 1)
    max_err = float(jnp.max(jnp.abs(out - ref)))
    # bf16 activations / bf16 final store -> tolerance sized for bf16 rounding.
    assert jnp.allclose(out, ref, atol=5e-3, rtol=5e-3), f"max_err={max_err}"
    print("KERNEL_OK")
</pallas_src>

<mosaic_0001>
module attributes {stable_mosaic.version = 11 : i64} {
  func.func @_linear_relu_stats_kernel(%arg0: i32, %arg1: memref<16x128xbf16, #tpu.memory_space<vmem>>, %arg2: memref<128x128xbf16, #tpu.memory_space<vmem>>, %arg3: memref<1x128xf32, #tpu.memory_space<vmem>>, %arg4: memref<16x128xbf16, #tpu.memory_space<vmem>>, %arg5: memref<8x128xf32, #tpu.memory_space<vmem>>) attributes {dimension_semantics = [#tpu.dimension_semantics<parallel>], iteration_bounds = array<i64: 2>, scalar_prefetch = 0 : i64, scratch_operands = 0 : i64, tpu.core_type = #tpu.core_type<tc>, window_params = [{transform_indices = @transform_0, window_bounds = array<i64: 16, 128>}, {pipeline_mode = #tpu.pipeline_mode<synchronous>, transform_indices = @transform_1, window_bounds = array<i64: 128, 128>}, {pipeline_mode = #tpu.pipeline_mode<synchronous>, transform_indices = @transform_2, window_bounds = array<i64: 1, 128>}, {transform_indices = @transform_3, window_bounds = array<i64: 16, 128>}, {transform_indices = @transform_4, window_bounds = array<i64: 8, 128>}]} {
    %c0 = arith.constant 0 : index
    %c0_0 = arith.constant 0 : index
    %0 = vector.load %arg1[%c0, %c0_0] : memref<16x128xbf16, #tpu.memory_space<vmem>>, vector<16x128xbf16>
    %c0_1 = arith.constant 0 : index
    %c0_2 = arith.constant 0 : index
    %1 = vector.load %arg2[%c0_1, %c0_2] : memref<128x128xbf16, #tpu.memory_space<vmem>>, vector<128x128xbf16>
    %cst = arith.constant dense<0.000000e+00> : vector<16x128xf32>
    %2 = tpu.matmul %0, %1, %cst {dimension_numbers = #tpu.dot_dimension_numbers<[1], [0], [0], [1], [0, 0, 1, 1], [], []>} : vector<16x128xbf16>, vector<128x128xbf16>, vector<16x128xf32> -> vector<16x128xf32>
    %c0_3 = arith.constant 0 : index
    %c0_4 = arith.constant 0 : index
    %3 = vector.load %arg3[%c0_3, %c0_4] : memref<1x128xf32, #tpu.memory_space<vmem>>, vector<1x128xf32>
    %4 = vector.broadcast %3 : vector<1x128xf32> to vector<16x128xf32>
    %5 = arith.addf %2, %4 : vector<16x128xf32>
    %cst_5 = arith.constant 0.000000e+00 : f32
    %6 = vector.broadcast %cst_5 : f32 to vector<16x128xf32>
    %7 = arith.maximumf %5, %6 : vector<16x128xf32>
    %8 = arith.truncf %7 : vector<16x128xf32> to vector<16x128xbf16>
    %c0_6 = arith.constant 0 : index
    %c0_7 = arith.constant 0 : index
    %9 = vector.load %arg4[%c0_6, %c0_7] : memref<16x128xbf16, #tpu.memory_space<vmem>>, vector<16x128xbf16>
    tpu.vector_store %arg4[%c0_6, %c0_7], %8 {strides = array<i32>} : memref<16x128xbf16, #tpu.memory_space<vmem>>, vector<16x128xbf16>,
    %10 = tpu.iota {dimensions = array<i32: 0>} : vector<16x128xi32>
    %c16_i32 = arith.constant 16 : i32
    %11 = arith.muli %arg0, %c16_i32 : i32
    %12 = vector.broadcast %11 : i32 to vector<16x128xi32>
    %13 = arith.addi %10, %12 : vector<16x128xi32>
    %c20_i32 = arith.constant 20 : i32
    %14 = vector.broadcast %c20_i32 : i32 to vector<16x128xi32>
    %15 = arith.cmpi slt, %13, %14 : vector<16x128xi32>
    %cst_8 = arith.constant 0.000000e+00 : f32
    %16 = vector.broadcast %cst_8 : f32 to vector<16x128xf32>
    %17 = arith.select %15, %7, %16 : vector<16x128xi1>, vector<16x128xf32>
    %cst_9 = arith.constant dense<0.000000e+00> : vector<128xf32>
    %18 = vector.multi_reduction <add>, %17, %cst_9 [0] : vector<16x128xf32> to vector<128xf32>
    %19 = vector.shape_cast %18 : vector<128xf32> to vector<1x128xf32>
    %20 = arith.mulf %17, %17 : vector<16x128xf32>
    %cst_10 = arith.constant dense<0.000000e+00> : vector<128xf32>
    %21 = vector.multi_reduction <add>, %20, %cst_10 [0] : vector<16x128xf32> to vector<128xf32>
    %22 = vector.shape_cast %21 : vector<128xf32> to vector<1x128xf32>
    %cst_11 = arith.constant 0.000000e+00 : f32
    %23 = vector.broadcast %cst_11 : f32 to vector<6x128xf32>
    %24 = tpu.concatenate %19, %22, %23 in 0 : vector<1x128xf32>, vector<1x128xf32>, vector<6x128xf32> -> vector<8x128xf32>
    %c0_12 = arith.constant 0 : index
    %c0_13 = arith.constant 0 : index
    %25 = vector.load %arg5[%c0_12, %c0_13] : memref<8x128xf32, #tpu.memory_space<vmem>>, vector<8x128xf32>
    tpu.vector_store %arg5[%c0_12, %c0_13], %24 {strides = array<i32>} : memref<8x128xf32, #tpu.memory_space<vmem>>, vector<8x128xf32>,
    return
  }
  func.func @transform_0(%arg0: i32) -> (i32, i32) {
    %c0_i32 = arith.constant 0 : i32
    %c0_i32_0 = arith.constant 0 : i32
    return %arg0, %c0_i32 : i32, i32
  }
  func.func @transform_1(%arg0: i32) -> (i32, i32) {
    %c0_i32 = arith.constant 0 : i32
    %c0_i32_0 = arith.constant 0 : i32
    %c0_i32_1 = arith.constant 0 : i32
    return %c0_i32, %c0_i32_0 : i32, i32
  }
  func.func @transform_2(%arg0: i32) -> (i32, i32) {
    %c0_i32 = arith.constant 0 : i32
    %c0_i32_0 = arith.constant 0 : i32
    %c0_i32_1 = arith.constant 0 : i32
    return %c0_i32, %c0_i32_0 : i32, i32
  }
  func.func @transform_3(%arg0: i32) -> (i32, i32) {
    %c0_i32 = arith.constant 0 : i32
    %c0_i32_0 = arith.constant 0 : i32
    return %arg0, %c0_i32 : i32, i32
  }
  func.func @transform_4(%arg0: i32) -> (i32, i32) {
    %c0_i32 = arith.constant 0 : i32
    %c0_i32_0 = arith.constant 0 : i32
    return %arg0, %c0_i32 : i32, i32
  }
}

module attributes {stable_mosaic.version = 11 : i64} {
  func.func @_linear_kernel(%arg0: i32, %arg1: memref<16x128xbf16, #tpu.memory_space<vmem>>, %arg2: memref<128x128xbf16, #tpu.memory_space<vmem>>, %arg3: memref<1x128xf32, #tpu.memory_space<vmem>>, %arg4: memref<16x128xbf16, #tpu.memory_space<vmem>>) attributes {dimension_semantics = [#tpu.dimension_semantics<parallel>], iteration_bounds = array<i64: 2>, scalar_prefetch = 0 : i64, scratch_operands = 0 : i64, tpu.core_type = #tpu.core_type<tc>, window_params = [{transform_indices = @transform_0, window_bounds = array<i64: 16, 128>}, {pipeline_mode = #tpu.pipeline_mode<synchronous>, transform_indices = @transform_1, window_bounds = array<i64: 128, 128>}, {pipeline_mode = #tpu.pipeline_mode<synchronous>, transform_indices = @transform_2, window_bounds = array<i64: 1, 128>}, {transform_indices = @transform_3, window_bounds = array<i64: 16, 128>}]} {
    %c0 = arith.constant 0 : index
    %c0_0 = arith.constant 0 : index
    %0 = vector.load %arg1[%c0, %c0_0] : memref<16x128xbf16, #tpu.memory_space<vmem>>, vector<16x128xbf16>
    %c0_1 = arith.constant 0 : index
    %c0_2 = arith.constant 0 : index
    %1 = vector.load %arg2[%c0_1, %c0_2] : memref<128x128xbf16, #tpu.memory_space<vmem>>, vector<128x128xbf16>
    %cst = arith.constant dense<0.000000e+00> : vector<16x128xf32>
    %2 = tpu.matmul %0, %1, %cst {dimension_numbers = #tpu.dot_dimension_numbers<[1], [0], [0], [1], [0, 0, 1, 1], [], []>} : vector<16x128xbf16>, vector<128x128xbf16>, vector<16x128xf32> -> vector<16x128xf32>
    %c0_3 = arith.constant 0 : index
    %c0_4 = arith.constant 0 : index
    %3 = vector.load %arg3[%c0_3, %c0_4] : memref<1x128xf32, #tpu.memory_space<vmem>>, vector<1x128xf32>
    %4 = vector.broadcast %3 : vector<1x128xf32> to vector<16x128xf32>
    %5 = arith.addf %2, %4 : vector<16x128xf32>
    %6 = arith.truncf %5 : vector<16x128xf32> to vector<16x128xbf16>
    %c0_5 = arith.constant 0 : index
    %c0_6 = arith.constant 0 : index
    %7 = vector.load %arg4[%c0_5, %c0_6] : memref<16x128xbf16, #tpu.memory_space<vmem>>, vector<16x128xbf16>
    tpu.vector_store %arg4[%c0_5, %c0_6], %6 {strides = array<i32>} : memref<16x128xbf16, #tpu.memory_space<vmem>>, vector<16x128xbf16>,
    return
  }
  func.func @transform_0(%arg0: i32) -> (i32, i32) {
    %c0_i32 = arith.constant 0 : i32
    %c0_i32_0 = arith.constant 0 : i32
    return %arg0, %c0_i32 : i32, i32
  }
  func.func @transform_1(%arg0: i32) -> (i32, i32) {
    %c0_i32 = arith.constant 0 : i32
    %c0_i32_0 = arith.constant 0 : i32
    %c0_i32_1 = arith.constant 0 : i32
    return %c0_i32, %c0_i32_0 : i32, i32
  }
  func.func @transform_2(%arg0: i32) -> (i32, i32) {
    %c0_i32 = arith.constant 0 : i32
    %c0_i32_0 = arith.constant 0 : i32
    %c0_i32_1 = arith.constant 0 : i32
    return %c0_i32, %c0_i32_0 : i32, i32
  }
  func.func @transform_3(%arg0: i32) -> (i32, i32) {
    %c0_i32 = arith.constant 0 : i32
    %c0_i32_0 = arith.constant 0 : i32
    return %arg0, %c0_i32 : i32, i32
  }
}

</mosaic_0001>

<bundles_post_ra>
// kernel: mlp_forward.5
= control target key start
LH: loop header
LB: loop body
LE: loop exit
PB: predicated region body
PF: predicated region fallthrough
CT: control target
= control target key end

     0   :  { %s469_s12 = smov 0   ;;  %s516_s0 = inlined_call_operand.vmem [shape: bf16[32,128], index: 0, kind: input, shape index: {}]   ;;  %s517_s1 = inlined_call_operand.vmem [shape: bf16[128,128], index: 1, kind: input, shape index: {}]   ;;  %s518_s2 = inlined_call_operand.vmem [shape: f32[1,128], index: 2, kind: input, shape index: {}]   ;;  %s519_s3 = inlined_call_operand.vmem [shape: bf16[32,128], index: 3, kind: output, shape index: {}]  }
   0x1 LB: > { %s361_s13 = sadd.s32 4294967295, %s445_s12   ;;  %p365_p0 = scmp.ge.s32.totalorder %s445_s12, 1  ;;  %s445_s12 = sphi %s469_s12, %s13_s12  }
   0x2   : > { %p138_p1 = scmp.lt.s32.totalorder %s445_s12, 3 }
   0x4   : > { %p139_p2 = pnand %p365_p0, %p138_p1 }
   0x5   : > { %v430_v0 = vld [vmem:[%s517_s1] sm:$0xff] (!%p139_p2)   ;;  %v447_v1 = vmov (!%p139_p2), 0.0   ;;  %v431_v2 = vld [vmem:[%s517_s1 + $0x8] sm:$0xff] (!%p139_p2)   ;;  %vm448_vm0 = vmmov (!%p139_p2), 0   ;;  %s366_s18 = sshll.u32 (!%p139_p2), %s361_s13, 1  ;;  %v432_v3 = vld [vmem:[%s517_s1 + $0x10] sm:$0xff] (!%p139_p2)  }
   0x6   : > { %142 = sbr.rel (%p139_p2) target bundleno = 257 (0x101), region = 32  ;;  %400 = vmatprep.subr.bf16.mxu0 (!%p139_p2), %v447_v1  ;;  %416 = vmatprep.mubr.msk.bf16.mxu0 (!%p139_p2), %vm448_vm0, %v447_v1  ;;  %p163_p3 = scmp.lt.s32.totalorder (!%p139_p2), %s366_s18, 3  ;;  %v433_v4 = vld [vmem:[%s517_s1 + $0x18] sm:$0xff] (!%p139_p2)   ;;  %v434_v5 = vld [vmem:[%s517_s1 + $0x20] sm:$0xff] (!%p139_p2)   ;;  %v435_v6 = vld [vmem:[%s517_s1 + $0x28] sm:$0xff] (!%p139_p2)  }
   0x7   : > { %401 = vmatpush3.bf16.msra.mxu0 (!%p139_p2), %v430_v0  ;;  %v436_v7 = vld [vmem:[%s517_s1 + $0x30] sm:$0xff] (!%p139_p2)   ;;  %v437_v8 = vld [vmem:[%s517_s1 + $0x38] sm:$0xff] (!%p139_p2)   ;;  %v370_v10 = vld [vmem:[%s518_s2] ss:$0 sm:$0xff] (!%p139_p2) }
   0x8   : > { %402 = vmatprep.subr.bf16.mxu0 (!%p139_p2), %v447_v1 }
   0xb   : > { %403 = vmatpush3.bf16.msra.mxu0 (!%p139_p2), %v431_v2 }
   0xc   : > { %404 = vmatprep.subr.bf16.mxu0 (!%p139_p2), %v447_v1 }
   0xd   : > { %s521_s18 = smov (!%p163_p3, %s366_s18), 3 }
   0xe   : > { %s367_s21 = sshll.u32 %s521_s18, 2 }
   0xf   : > { %s166_s24 = scalar_lea.vmem %s516_s0, %s367_s21  ;;  %405 = vmatpush3.bf16.msra.mxu0 %v432_v3  ;;  %s172_s13 = scalar_lea.vmem %s519_s3, %s367_s21 }
  0x10   : > { %406 = vmatprep.subr.bf16.mxu0 %v447_v1  ;;  %v438_v9 = vld [vmem:[%s166_s24] sm:$0xff]  }
  0x13   : > { %407 = vmatpush3.bf16.msra.mxu0 %v433_v4 }
  0x14   : > { %408 = vmatprep.subr.bf16.mxu0 %v447_v1 }
  0x17   : > { %409 = vmatpush3.bf16.msra.mxu0 %v434_v5 }
  0x18   : > { %410 = vmatprep.subr.bf16.mxu0 %v447_v1 }
  0x1b   : > { %411 = vmatpush3.bf16.msra.mxu0 %v435_v6 }
  0x1c   : > { %412 = vmatprep.subr.bf16.mxu0 %v447_v1 }
  0x1f   : > { %413 = vmatpush3.bf16.msra.mxu0 %v436_v7 }
  0x20   : > { %414 = vmatprep.subr.bf16.mxu0 %v447_v1 }
  0x23   : > { %415 = vmatpush3.bf16.msra.mxu0 %v437_v8 }
  0x26   : > { %417 = vmatmul.mubr.bf16.vlgmr.msra.gmra.mrb[0].mxu0 %v438_v9 }
  0xf9   : > { %v288_v11 = vpop.f32.mrb[0].mxu0 }
  0xfa   : > { %v418_v12 = vpop.f32.mrb[1].mxu0  ;;  %v289_v14 = vadd.f32 %v370_v10, %v288_v11 }
  0xfb   : > { %v291_v13 = vpop.f32.mrb[2].mxu0 }
  0xfc   : > { %v292_v15 = vadd.f32 %v370_v10, %v291_v13  ;;  %v419_v16 = vpop.f32.mrb[3].mxu0 }
  0xfe   : > { %v389_v17 = vpack.c.bf16 %v292_v15, %v289_v14 }
 0x100   : > { %390 = vst [vmem:[%s172_s13] sm:$0xff] %v389_v17  }
 0x101 PF: > { %s13_s12 = sadd.s32 1, %s445_s12  }
 0x102   : > { %p10_p4 = scmp.ge.s32.totalorder %s13_s12, 4  }
 0x104   :  { %12 = sbr.rel (!%p10_p4) target bundleno = 1 (0x1), region = 62 }

// kernel: mlp_forward.3
= control target key start
LH: loop header
LB: loop body
LE: loop exit
PB: predicated region body
PF: predicated region fallthrough
CT: control target
= control target key end

     0   :  { %s579_s15 = smov 0   ;;  %s639_s0 = inlined_call_operand.vmem [shape: bf16[32,128], index: 0, kind: input, shape index: {}]   ;;  %s640_s1 = inlined_call_operand.vmem [shape: bf16[128,128], index: 1, kind: input, shape index: {}]   ;;  %s641_s2 = inlined_call_operand.vmem [shape: f32[1,128], index: 2, kind: input, shape index: {}]   ;;  %s642_s3 = inlined_call_operand.vmem [shape: bf16[32,128], index: 3, kind: output, shape index: {0}]   ;;  %s643_s4 = inlined_call_operand.vmem [shape: f32[16,128], index: 4, kind: output, shape index: {1}]  }
   0x1 LB: > { %s585_s16 = sadd.s32 4294967295, %s550_s15   ;;  %p468_p0 = scmp.ge.s32.totalorder %s550_s15, 1  ;;  %s550_s15 = sphi %s579_s15, %s15_s15  }
   0x2   : > { %p166_p1 = scmp.lt.s32.totalorder %s550_s15, 3 }
   0x4   : > { %p167_p2 = pnand %p468_p0, %p166_p1 }
   0x5   : > { %v535_v0 = vld [vmem:[%s640_s1] sm:$0xff] (!%p167_p2)   ;;  %v552_v1 = vmov (!%p167_p2), 0.0   ;;  %v536_v2 = vld [vmem:[%s640_s1 + $0x8] sm:$0xff] (!%p167_p2)   ;;  %vm553_vm0 = vmmov (!%p167_p2), 0   ;;  %s469_s21 = sshll.u32 (!%p167_p2), %s585_s16, 1  ;;  %v537_v3 = vld [vmem:[%s640_s1 + $0x10] sm:$0xff] (!%p167_p2)   ;;  %v345_v10 = vlaneseq (!%p167_p2) }
   0x6   : > { %170 = sbr.rel (%p167_p2) target bundleno = 276 (0x114), region = 32  ;;  %505 = vmatprep.subr.bf16.mxu0 (!%p167_p2), %v552_v1  ;;  %521 = vmatprep.mubr.msk.bf16.mxu0 (!%p167_p2), %vm553_vm0, %v552_v1  ;;  %p197_p3 = scmp.lt.s32.totalorder (!%p167_p2), %s469_s21, 3  ;;  %v538_v4 = vld [vmem:[%s640_s1 + $0x18] sm:$0xff] (!%p167_p2)   ;;  %v539_v5 = vld [vmem:[%s640_s1 + $0x20] sm:$0xff] (!%p167_p2)   ;;  %v540_v6 = vld [vmem:[%s640_s1 + $0x28] sm:$0xff] (!%p167_p2)   ;;  %vm372_vm3 = vcmask (!%p167_p2), 1040384  }
   0x7   : > { %506 = vmatpush3.bf16.msra.mxu0 (!%p167_p2), %v535_v0  ;;  %v541_v7 = vld [vmem:[%s640_s1 + $0x30] sm:$0xff] (!%p167_p2)   ;;  %v542_v8 = vld [vmem:[%s640_s1 + $0x38] sm:$0xff] (!%p167_p2)   ;;  %v346_v11 = vshrl.u32 (!%p167_p2), %v345_v10, 7  ;;  %s486_s12 = sshll.u32 (!%p167_p2), %s585_s16, 4  ;;  %v474_v14 = vld [vmem:[%s641_s2] ss:$0 sm:$0xff] (!%p167_p2) }
   0x8   : > { %507 = vmatprep.subr.bf16.mxu0 (!%p167_p2), %v552_v1  ;;  %v349_v12 = vstv (!%p167_p2), %s486_s12  ;;  %p208_p4 = scmp.lt.s32.totalorder (!%p167_p2), %s585_s16, 1  ;;  %vm374_vm4 = vcmask (!%p167_p2), 1041408  }
   0x9   : > { %v347_v13 = vadd.s32 (!%p167_p2), 8, %v346_v11  ;;  %v350_v15 = vadd.s32 (!%p167_p2), %v349_v12, %v346_v11 }
   0xb   : > { %508 = vmatpush3.bf16.msra.mxu0 (!%p167_p2), %v536_v2  ;;  %v351_v17 = vadd.s32 (!%p167_p2), %v349_v12, %v347_v13  ;;  %vm352_vm1 = vcmp.lt.s32.totalorder (!%p167_p2), %v350_v15, 20 }
   0xc   : > { %509 = vmatprep.subr.bf16.mxu0 (!%p167_p2), %v552_v1 }
   0xd   : > { %s645_s21 = smov (!%p197_p3, %s469_s21), 3  ;;  %vm353_vm2 = vcmp.lt.s32.totalorder %v351_v17, 20  ;;  %s647_s16 = smov (!%p208_p4, %s585_s16), 1 }
   0xe   : > { %s470_s24 = sshll.u32 %s645_s21, 2  ;;  %s473_s20 = sshll.u32 %s647_s16, 3 }
   0xf   : > { %s200_s27 = scalar_lea.vmem %s639_s0, %s470_s24  ;;  %510 = vmatpush3.bf16.msra.mxu0 %v537_v3  ;;  %s206_s19 = scalar_lea.vmem %s642_s3, %s470_s24 }
  0x10   : > { %511 = vmatprep.subr.bf16.mxu0 %v552_v1  ;;  %v543_v9 = vld [vmem:[%s200_s27] sm:$0xff]   ;;  %s211_s23 = scalar_lea.vmem %s643_s4, %s473_s20 }
  0x13   : > { %512 = vmatpush3.bf16.msra.mxu0 %v538_v4 }
  0x14   : > { %513 = vmatprep.subr.bf16.mxu0 %v552_v1 }
  0x17   : > { %514 = vmatpush3.bf16.msra.mxu0 %v539_v5 }
  0x18   : > { %515 = vmatprep.subr.bf16.mxu0 %v552_v1 }
  0x1b   : > { %516 = vmatpush3.bf16.msra.mxu0 %v540_v6 }
  0x1c   : > { %517 = vmatprep.subr.bf16.mxu0 %v552_v1 }
  0x1f   : > { %518 = vmatpush3.bf16.msra.mxu0 %v541_v7 }
  0x20   : > { %519 = vmatprep.subr.bf16.mxu0 %v552_v1 }
  0x23   : > { %520 = vmatpush3.bf16.msra.mxu0 %v542_v8 }
  0x26   : > { %522 = vmatmul.mubr.bf16.vlgmr.msra.gmra.mrb[0].mxu0 %v543_v9 }
  0xf9   : > { %v326_v16 = vpop.f32.mrb[0].mxu0 }
  0xfa   : > { %v327_v18 = vadd.f32 %v474_v14, %v326_v16  ;;  %v523_v19 = vpop.f32.mrb[1].mxu0 }
  0xfb   : > { %v329_v20 = vpop.f32.mrb[2].mxu0 }
  0xfc   : > { %v333_v21 = vmax.f32 %v327_v18, 0.0  ;;  %v330_v22 = vadd.f32 %v474_v14, %v329_v20  ;;  %v524_v23 = vpop.f32.mrb[3].mxu0 }
  0xfe   : > { %v354_v24 = vsel %vm352_vm1, %v333_v21, 0.0  ;;  %v334_v25 = vmax.f32 %v330_v22, 0.0 }
  0xff   : > { %v363_v28 = vmul.f32 %v354_v24, %v354_v24 }
 0x100   : > { %v494_v26 = vpack.c.bf16 %v334_v25, %v333_v21  ;;  %v355_v27 = vsel %vm353_vm2, %v334_v25, 0.0 }
 0x101   : > { %v356_v29 = vadd.f32 %v355_v27, %v354_v24  ;;  %v364_v30 = vmul.f32 %v355_v27, %v355_v27 }
 0x102   : > { %495 = vst [vmem:[%s206_s19] sm:$0xff] %v494_v26  }
 0x103   : > { %v357_v31 = vrot.slane %v356_v29, 4  ;;  %v365_v32 = vadd.f32 %v364_v30, %v363_v28 }
 0x105   : > { %v358_v33 = vadd.f32 %v357_v31, %v356_v29  ;;  %v366_v34 = vrot.slane %v365_v32, 4 }
 0x107   : > { %v359_v35 = vrot.slane %v358_v33, 2  ;;  %v367_v36 = vadd.f32 %v366_v34, %v365_v32 }
 0x109   : > { %v360_v37 = vadd.f32 %v359_v35, %v358_v33  ;;  %v368_v38 = vrot.slane %v367_v36, 2 }
 0x10b   : > { %v361_v39 = vrot.slane %v360_v37, 1  ;;  %v369_v40 = vadd.f32 %v368_v38, %v367_v36 }
 0x10d   : > { %v370_v41 = vrot.slane %v369_v40, 1  ;;  %v362_v42 = vadd.f32 %v361_v39, %v360_v37 }
 0x10f   : > { %v371_v43 = vadd.f32 %v370_v41, %v369_v40 }
 0x111   : > { %v373_v44 = vsel %vm372_vm3, %v362_v42, %v371_v43 }
 0x112   : > { %v375_v45 = vsel %vm374_vm4, %v373_v44, 0.0 }
 0x113   : > { %376 = vst [vmem:[%s211_s23] sm:$0xff] %v375_v45 }
 0x114 PF: > { %s15_s15 = sadd.s32 1, %s550_s15  }
 0x115   : > { %p12_p5 = scmp.ge.s32.totalorder %s15_s15, 4  }
 0x117   :  { %14 = sbr.rel (!%p12_p5) target bundleno = 1 (0x1), region = 74 }

</bundles_post_ra>
